<compile_context>
chip_gen: v5e
topology: v5e:2x2
jax: 0.10.0
libtpu: 0.0.40
codegen_flags: <defaults>
</compile_context>

<pallas_src>
import jax
import jax.numpy as jnp
from jax.experimental import pallas as pl
from jax.experimental.pallas import tpu as pltpu

_LANE = 128


def automatic_weighted_loss_ref(params: jax.Array, losses: jax.Array) -> jax.Array:
    """Pure-jnp reference (also the recommended path for training / autodiff)."""
    p2 = params.astype(jnp.float32) ** 2
    return jnp.sum(0.5 / p2 * losses.astype(jnp.float32) + jnp.log(1.0 + p2), axis=-1)


# ----------------------------------------------------------------------------
# Kernel: lane-dense batched forward.
# ----------------------------------------------------------------------------
def _awl_kernel(params_ref, losses_ref, out_ref):
    # params_ref: (num, 1)  f32 VMEM  (resident: constant index_map)
    # losses_ref: (num, TB) f32 VMEM  (batch on the lane axis)
    # out_ref:    (1, TB)   f32 VMEM  (lane-dense output slab)
    p = params_ref[...]                       # (num, 1)
    p2 = p * p
    w = 0.5 / p2                              # exact division (matches PyTorch)
    # NOTE: log(1 + p2) matches the PyTorch forward exactly; log1p would be more
    # accurate for tiny p2 but is not what the module computes.
    reg = jnp.log(1.0 + p2)                   # (num, 1)

    terms = w * losses_ref[...] + reg         # (num, TB), lane-broadcast of (num, 1)

    # Sum over the `num` tasks with static VPU adds (no XLU cross-lane reduce).
    num = terms.shape[0]
    acc = terms[0:1, :]
    for i in range(1, num):
        acc = acc + terms[i:i + 1, :]
    out_ref[...] = acc                        # (1, TB)


def _pad_to(x: int, m: int) -> int:
    return ((x + m - 1) // m) * m


def automatic_weighted_loss_batched(params: jax.Array, losses: jax.Array) -> jax.Array:
    """params: (num,) f32; losses: (B, num) f32. Returns (B,) f32 per-set loss sums."""
    b, num = losses.shape
    params_col = params.astype(jnp.float32).reshape(num, 1)
    # Batch on lanes: (num, B). Cheap layout plumbing on tiny data.
    losses_t = losses.astype(jnp.float32).T

    # 1 grid step for small batches; 2 steps (one per v7x TensorCore) otherwise.
    if _pad_to(b, _LANE) > _LANE:
        n_tiles = 2
        padded_b = _pad_to(b, 2 * _LANE)
    else:
        n_tiles = 1
        padded_b = _pad_to(b, _LANE)
    tb = padded_b // n_tiles                  # multiple of 128 -> lane-dense blocks

    if padded_b != b:
        losses_t = jnp.pad(losses_t, ((0, 0), (0, padded_b - b)))

    out = pl.pallas_call(
        _awl_kernel,
        out_shape=jax.ShapeDtypeStruct((1, padded_b), jnp.float32),
        grid=(n_tiles,),
        in_specs=[
            pl.BlockSpec((num, 1), lambda i: (0, 0)),    # shared params, resident
            pl.BlockSpec((num, tb), lambda i: (0, i)),   # batch tile on lanes
        ],
        out_specs=pl.BlockSpec((1, tb), lambda i: (0, i)),
        compiler_params=pltpu.CompilerParams(
            dimension_semantics=("parallel",),  # lets v7x's 2 TCs split the 2 tiles
        ),
    )(params_col, losses_t)
    return out[0, :b]


def automatic_weighted_loss(params: jax.Array, losses: jax.Array) -> jax.Array:
    """Module-equivalent forward: params (num,), losses (num,) -> scalar.

    Folded into the batched kernel as B=1 (the standalone single-set kernel was
    pure launch overhead)."""
    return automatic_weighted_loss_batched(params, losses.reshape(1, -1)).reshape(())


if __name__ == "__main__":
    num = 2  # AutomaticWeightedLoss(num=2)

    # Parameters: torch.ones(num) in __init__ -> deterministic ones.
    params = jnp.ones((num,), dtype=jnp.float32)

    # Example per-task scalar losses (positive, deterministic).
    key = jax.random.PRNGKey(0)
    losses = jax.random.uniform(key, (num,), dtype=jnp.float32,
                                minval=0.5, maxval=3.0)

    # --- single loss-set (module semantics) ---
    single_fn = jax.jit(automatic_weighted_loss)
    result = jax.block_until_ready(single_fn(params, losses))
    ref = automatic_weighted_loss_ref(params, losses)
    assert jnp.allclose(result, ref, rtol=1e-5, atol=1e-5), (result, ref)

    # --- batched loss-sets (amortizes launch/DMA overhead) ---
    B = 16
    losses_b = jax.random.uniform(jax.random.PRNGKey(1), (B, num),
                                  dtype=jnp.float32, minval=0.5, maxval=3.0)
    batched_fn = jax.jit(automatic_weighted_loss_batched)
    result_b = jax.block_until_ready(batched_fn(params, losses_b))
    ref_b = automatic_weighted_loss_ref(params[None, :], losses_b)
    assert jnp.allclose(result_b, ref_b, rtol=1e-5, atol=1e-5), (result_b, ref_b)

    print("KERNEL_OK")
</pallas_src>

<mosaic_0001>
module attributes {stable_mosaic.version = 11 : i64} {
  func.func @_awl_kernel(%arg0: i32, %arg1: memref<2x1xf32, #tpu.memory_space<vmem>>, %arg2: memref<2x128xf32, #tpu.memory_space<vmem>>, %arg3: memref<1x128xf32, #tpu.memory_space<vmem>>) attributes {dimension_semantics = [#tpu.dimension_semantics<parallel>], iteration_bounds = array<i64: 1>, scalar_prefetch = 0 : i64, scratch_operands = 0 : i64, tpu.core_type = #tpu.core_type<tc>, window_params = [{pipeline_mode = #tpu.pipeline_mode<synchronous>, transform_indices = @transform_0, window_bounds = array<i64: 2, 1>}, {transform_indices = @transform_1, window_bounds = array<i64: 2, 128>}, {transform_indices = @transform_2, window_bounds = array<i64: 1, 128>}]} {
    %c0 = arith.constant 0 : index
    %c0_0 = arith.constant 0 : index
    %0 = vector.load %arg1[%c0, %c0_0] : memref<2x1xf32, #tpu.memory_space<vmem>>, vector<2x1xf32>
    %1 = arith.mulf %0, %0 : vector<2x1xf32>
    %cst = arith.constant 5.000000e-01 : f32
    %2 = vector.broadcast %cst : f32 to vector<2x1xf32>
    %3 = arith.divf %2, %1 : vector<2x1xf32>
    %cst_1 = arith.constant 1.000000e+00 : f32
    %4 = vector.broadcast %cst_1 : f32 to vector<2x1xf32>
    %5 = arith.addf %4, %1 : vector<2x1xf32>
    %6 = math.log %5 : vector<2x1xf32>
    %c0_2 = arith.constant 0 : index
    %c0_3 = arith.constant 0 : index
    %7 = vector.load %arg2[%c0_2, %c0_3] : memref<2x128xf32, #tpu.memory_space<vmem>>, vector<2x128xf32>
    %8 = vector.broadcast %3 : vector<2x1xf32> to vector<2x128xf32>
    %9 = arith.mulf %8, %7 : vector<2x128xf32>
    %10 = vector.broadcast %6 : vector<2x1xf32> to vector<2x128xf32>
    %11 = arith.addf %9, %10 : vector<2x128xf32>
    %12 = vector.extract_strided_slice %11 {offsets = [0, 0], sizes = [1, 128], strides = [1, 1]} : vector<2x128xf32> to vector<1x128xf32>
    %13 = vector.extract_strided_slice %11 {offsets = [1, 0], sizes = [1, 128], strides = [1, 1]} : vector<2x128xf32> to vector<1x128xf32>
    %14 = arith.addf %12, %13 : vector<1x128xf32>
    %c0_4 = arith.constant 0 : index
    %c0_5 = arith.constant 0 : index
    %15 = vector.load %arg3[%c0_4, %c0_5] : memref<1x128xf32, #tpu.memory_space<vmem>>, vector<1x128xf32>
    tpu.vector_store %arg3[%c0_4, %c0_5], %14 {strides = array<i32>} : memref<1x128xf32, #tpu.memory_space<vmem>>, vector<1x128xf32>,
    return
  }
  func.func @transform_0(%arg0: i32) -> (i32, i32) {
    %c0_i32 = arith.constant 0 : i32
    %c0_i32_0 = arith.constant 0 : i32
    %c0_i32_1 = arith.constant 0 : i32
    return %c0_i32, %c0_i32_0 : i32, i32
  }
  func.func @transform_1(%arg0: i32) -> (i32, i32) {
    %c0_i32 = arith.constant 0 : i32
    %c0_i32_0 = arith.constant 0 : i32
    return %c0_i32, %arg0 : i32, i32
  }
  func.func @transform_2(%arg0: i32) -> (i32, i32) {
    %c0_i32 = arith.constant 0 : i32
    %c0_i32_0 = arith.constant 0 : i32
    return %c0_i32, %arg0 : i32, i32
  }
}

</mosaic_0001>

<bundles_post_ra>
// kernel: automatic_weighted_loss.1
= control target key start
LH: loop header
LB: loop body
LE: loop exit
PB: predicated region body
PF: predicated region fallthrough
CT: control target
= control target key end

     0   :  { %v99_v1 = vmov 0   ;;  %s125_s0 = inlined_call_operand.vmem [shape: f32[2,1], index: 0, kind: input, shape index: {}]   ;;  %s126_s1 = inlined_call_operand.vmem [shape: f32[2,128], index: 1, kind: input, shape index: {}]   ;;  %s127_s2 = inlined_call_operand.hbm [shape: f32[1,128], index: 2, kind: output, shape index: {}]  }
   0x1   :  { %v12_v0 = vld [vmem:[%s125_s0] sm:$0x3]  ;;  %68 = vset.pattern.permute.xlu0 %v99_v1 }
   0x2   :  { %v13_v2 = vmul.f32 %v12_v0, %v12_v0 }
   0x3   :  { %7 = vsyncpa [#allocation3], 0  ;;  %v32_v18 = vld [vmem:[%s126_s1] sm:$0x3]  ;;  %s100_s12 = smov [#allocation2]   ;;  %s57_s16 = sshll.u32 %s127_s2, 4  ;;  %s58_s16 = int_to_ptr.hbm [resolvable:$true] %s57_s16 }
   0x4   :  { %69 = vrcp.f32 %v13_v2  ;;  %v25_v5 = vand.u32 2147483648, %v13_v2  ;;  %vm19_vm0 = vweird.f32 %v13_v2  ;;  %v23_v7 = vand.u32 2147483647, %v13_v2  ;;  %s55_s13 = sshll.u32 %s100_s12, 4  ;;  %s56_s13 = int_to_ptr.vmem [resolvable:$true] %s55_s13 }
   0x5   :  { %v29_v8 = vadd.f32 1.0, %v13_v2 }
   0x6   :  { %v26_v10 = vor.u32 1.1754944e-38, %v25_v5  ;;  %vm24_vm3 = vcmp.eq.f32.partialorder %v23_v7, 8.507059e+37 }
   0x7   :  { %71 = vlog2.f32 %v29_v8 }
   0xa   :  { %v70_v3 = vpop.eup %69 }
   0xb   :  { %v15_v4 = vmul.f32 %v70_v3, %v13_v2  ;;  %vm20_vm1 = vweird.f32 %v70_v3 }
   0xc   :  { %vm21_vm2 = vmor %vm19_vm0, %vm20_vm1 }
   0xd   :  { %v16_v6 = vsub.f32 1.0, %v15_v4  ;;  %v72_v15 = vpop.eup %71 }
   0xe   :  { %v31_v16 = vmul.f32 0.6931472, %v72_v15 }
   0xf   :  { %v17_v9 = vmul.f32 %v70_v3, %v16_v6 }
  0x11   :  { %v18_v11 = vadd.f32 %v70_v3, %v17_v9 }
  0x13   :  { %v22_v12 = vsel %vm21_vm2, %v70_v3, %v18_v11 }
  0x14   :  { %v27_v13 = vsel %vm24_vm3, %v26_v10, %v22_v12 }
  0x15   :  { %v28_v14 = vmul.f32 0.5, %v27_v13 }
  0x17   :  { %35 = vperm.xlu0 %68, %v28_v14  }
  0x1f   :  { %41 = vperm.xlu0 %68, %v31_v16  }
  0x89   :  { %v36_v17 = vpop.permute.xlu0 %35 }
  0x8a   :  { %v38_v19 = vmul.f32 %v36_v17, %v32_v18 }
  0x91   :  { %v42_v20 = vpop.permute.xlu0 %41 }
  0x92   :  { %v44_v21 = vadd.f32 %v42_v20, %v38_v19 }
  0x94   :  { %v46_v22 = vrot.slane %v44_v21, 1 }
  0x96   :  { %v48_v23 = vadd.f32 %v46_v22, %v44_v21 }
  0x98   :  { %49 = vst [vmem:[#allocation2] sm:$0x1] %v48_v23 }
  0x99   :  { %60 = dma.vmem_to_hbm [thread:$0]  %s56_s13, 16, %s58_s16, [#allocation3]  }
  0x9a   :  { %97 = dma.done.wait [#allocation3], 16  }
  0x9b   :  { %98 = vsyncadd [#allocation3], 4294967280 }
  0x9c   :  { %65 = vsyncpa [#allocation3], 1 }

</bundles_post_ra>
